<compile_context>
chip_gen: v6e
topology: v6e:2x2x1
jax: 0.10.0
libtpu: 0.0.40
codegen_flags: <defaults>
</compile_context>

<pallas_src>
import functools

import jax
import jax.numpy as jnp
from jax.experimental import pallas as pl
from jax.experimental.pallas import tpu as pltpu

FOCAL_ALPHA = 0.25  # SetCriterion focal_alpha
# gamma is hard-coded to 2 at every call site in the module -> squared in-kernel.


def _round_up(x, m):
    return (x + m - 1) // m * m


def _cdiv(a, b):
    return -(-a // b)


# --------------------------------------------------------------------------- #
# Pallas kernel: single pass over the (B, Q, C) logits.
# Outputs per image (resident (1, 8, 128) accumulator blocks, value broadcast):
#   neg_ref : sum over all (q, c) of the t=0 ("background") focal term
#             (1-alpha) * BCE(x, 0) * sigmoid(x)^2
#   card_ref: count of rows q whose argmax over classes != C-1
# --------------------------------------------------------------------------- #
def _focal_card_kernel(logits_ref, neg_ref, card_ref, *,
                       num_classes, alpha, num_real_rows, block_rows,
                       has_row_pad):
    qi = pl.program_id(1)

    @pl.when(qi == 0)
    def _():
        neg_ref[...] = jnp.zeros_like(neg_ref)
        card_ref[...] = jnp.zeros_like(card_ref)

    x = logits_ref[...]                                     # (1, tq, C) f32

    if has_row_pad:
        row = jax.lax.broadcasted_iota(jnp.int32, (1, block_rows, 1), 1)
        row_valid = (qi * block_rows + row) < num_real_rows  # (1, tq, 1)

    # ---- background focal term (EUP: exp + log1p + approx recip) ---------- #
    e = jnp.exp(-jnp.abs(x))
    log1pe = jnp.log1p(e)
    inv = pl.reciprocal(1.0 + e, approx=True)
    p = jnp.where(x >= 0.0, inv, e * inv)                   # sigmoid(x), VPU-only
    # BCE(x, 0) = max(x, 0) + log1p(exp(-|x|)); (1 - p_t)^2 = p^2 for t=0
    neg = (1.0 - alpha) * (jnp.maximum(x, 0.0) + log1pe) * p * p
    if has_row_pad:
        neg = jnp.where(row_valid, neg, 0.0)
    neg_ref[...] += jnp.sum(neg)

    # ---- fused cardinality count: argmax over classes != C-1 -------------- #
    if num_classes >= 2:
        lane = jax.lax.broadcasted_iota(jnp.int32, x.shape, 2)
        m_first = jnp.max(jnp.where(lane < num_classes - 1, x, -jnp.inf),
                          axis=-1, keepdims=True)
        x_last = jnp.max(jnp.where(lane == num_classes - 1, x, -jnp.inf),
                         axis=-1, keepdims=True)
        not_bg = (m_first >= x_last).astype(jnp.float32)    # (1, tq, 1)
        if has_row_pad:
            not_bg = jnp.where(row_valid, not_bg, 0.0)
        card_ref[...] += jnp.sum(not_bg)
    # num_classes == 1: argmax is always C-1 -> count stays 0.


def _choose_row_tiling(Q, C, vmem_tile_bytes=4 * 1024 * 1024):
    """Pick (tq, Qp, n_q) so a (1, tq, C) f32 tile (lane-padded) is ~<=4 MB and
    row padding is minimal (zero when Q fits in one full-extent tile)."""
    cpad = _round_up(max(C, 1), 128)
    max_rows = max(8, (vmem_tile_bytes // (cpad * 4)) // 8 * 8)
    n_q = _cdiv(Q, max_rows)
    if n_q == 1:
        return Q, Q, 1                       # full-extent tile, no padding
    tq = _round_up(_cdiv(Q, n_q), 8)
    return tq, tq * n_q, n_q


def focal_background_and_cardinality_sums(pred_logits, *, alpha):
    """pred_logits: (B, Q, C) float.
    Returns (neg_per_b: (B,), card_per_b: (B,)) f32."""
    B, Q, C = pred_logits.shape
    logits = pred_logits.astype(jnp.float32)
    tq, Qp, n_q = _choose_row_tiling(Q, C)
    if Qp != Q:
        logits = jnp.pad(logits, ((0, 0), (0, Qp - Q), (0, 0)))

    kernel = functools.partial(
        _focal_card_kernel, num_classes=C, alpha=float(alpha),
        num_real_rows=Q, block_rows=tq, has_row_pad=(Qp != Q))

    neg, card = pl.pallas_call(
        kernel,
        out_shape=(jax.ShapeDtypeStruct((B, 8, 128), jnp.float32),
                   jax.ShapeDtypeStruct((B, 8, 128), jnp.float32)),
        grid=(B, n_q),
        in_specs=[pl.BlockSpec((1, tq, C), lambda b, i: (b, i, 0))],
        out_specs=(pl.BlockSpec((1, 8, 128), lambda b, i: (b, 0, 0)),
                   pl.BlockSpec((1, 8, 128), lambda b, i: (b, 0, 0))),
        compiler_params=pltpu.CompilerParams(
            dimension_semantics=("parallel", "arbitrary")),
        cost_estimate=pl.CostEstimate(
            flops=14 * B * Qp * C,
            transcendentals=3 * B * Qp * C,
            bytes_accessed=B * Qp * C * 4 + 2 * B * 8 * 128 * 4),
    )(logits)
    return neg[:, 0, 0], card[:, 0, 0]


# --------------------------------------------------------------------------- #
# SetCriterion.forward — plain-JAX glue around the single Pallas kernel.
# --------------------------------------------------------------------------- #
def set_criterion_forward(pred_logits, pred_boxes, gt_labels, gt_boxes,
                          src_idx, tgt_idx, *, focal_alpha=FOCAL_ALPHA):
    """
    pred_logits: (B, Q, C) f32          pred_boxes: (B, Q, 4) f32 cxcywh
    gt_labels:   (B, T) int32 (-1 pad)  gt_boxes:   (B, T, 4) f32 cxcywh
    src_idx / tgt_idx: (B, T) int32 matcher output (query idx / target idx),
                       -1 marks unmatched / padded slots.
    Returns dict of scalar losses (loss_ce, class_error, cardinality_error,
    loss_bbox, loss_giou) — identical to SetCriterion.forward with
    losses=['labels','boxes','cardinality'] and the default focal-loss path.
    """
    B, Q, C = pred_logits.shape
    T = gt_labels.shape[1]

    tgt_valid = gt_labels >= 0                                  # (B, T)
    num_boxes = jnp.maximum(jnp.sum(tgt_valid.astype(jnp.float32)), 1.0)

    match_valid = (src_idx >= 0) & (tgt_idx >= 0)               # (B, T)
    src_c = jnp.clip(src_idx, 0, Q - 1)
    tgt_c = jnp.clip(tgt_idx, 0, T - 1)
    matched_labels = jnp.take_along_axis(gt_labels, tgt_c, axis=1)   # (B, T)

    # ---- single Pallas pass over the logits -------------------------------- #
    neg_per_b, card_per_b = focal_background_and_cardinality_sums(
        pred_logits, alpha=focal_alpha)

    # ---- loss_ce: background sum + O(num_boxes) positive correction -------- #
    #   total focal sum = sum_all neg(x) + sum_{matched (q,l)} [pos(x) - neg(x)]
    #   loss.mean(1).sum()/num_boxes * Q  ==  loss.sum()/num_boxes
    matched_logits = jnp.take_along_axis(pred_logits, src_c[..., None], axis=1)  # (B,T,C)
    lbl_c = jnp.clip(matched_labels, 0, C - 1)
    x_pos = jnp.take_along_axis(matched_logits, lbl_c[..., None], axis=2)[..., 0]  # (B,T)
    p = jax.nn.sigmoid(x_pos)
    pos_term = focal_alpha * jax.nn.softplus(-x_pos) * (1.0 - p) ** 2     # t = 1
    neg_term = (1.0 - focal_alpha) * jax.nn.softplus(x_pos) * p ** 2      # t = 0
    corr = jnp.sum(jnp.where(match_valid, pos_term - neg_term, 0.0))
    loss_ce = (jnp.sum(neg_per_b) + corr) / num_boxes

    # ---- class_error (logging: top-1 accuracy of matched queries) ---------- #
    pred_cls = jnp.argmax(matched_logits, axis=-1)
    n_match = jnp.maximum(jnp.sum(match_valid.astype(jnp.float32)), 1.0)
    acc = 100.0 * jnp.sum(((pred_cls == matched_labels) & match_valid)
                          .astype(jnp.float32)) / n_match
    class_error = 100.0 - acc

    # ---- cardinality_error (logging, no grad; counts from the kernel) ------ #
    tgt_lengths = jnp.sum(tgt_valid.astype(jnp.float32), axis=1)
    cardinality_error = jnp.mean(jnp.abs(card_per_b - tgt_lengths))

    # ---- loss_boxes: L1 + GIoU over matched pairs (plain JAX, tiny) -------- #
    src_b = jnp.take_along_axis(pred_boxes, src_c[..., None], axis=1)    # (B,T,4)
    tgt_b = jnp.take_along_axis(gt_boxes, tgt_c[..., None], axis=1)      # (B,T,4)
    valid_f = match_valid.astype(jnp.float32)

    l1 = jnp.sum(jnp.abs(src_b - tgt_b), axis=-1)                        # (B,T)
    loss_bbox = jnp.sum(l1 * valid_f) / num_boxes

    def cxcywh_to_xyxy(b):
        cx, cy, w, h = b[..., 0], b[..., 1], b[..., 2], b[..., 3]
        return cx - 0.5 * w, cy - 0.5 * h, cx + 0.5 * w, cy + 0.5 * h

    sx0, sy0, sx1, sy1 = cxcywh_to_xyxy(src_b)
    tx0, ty0, tx1, ty1 = cxcywh_to_xyxy(tgt_b)
    iw = jnp.maximum(jnp.minimum(sx1, tx1) - jnp.maximum(sx0, tx0), 0.0)
    ih = jnp.maximum(jnp.minimum(sy1, ty1) - jnp.maximum(sy0, ty0), 0.0)
    inter = iw * ih
    union = (sx1 - sx0) * (sy1 - sy0) + (tx1 - tx0) * (ty1 - ty0) - inter
    iou = inter / jnp.where(match_valid, union, 1.0)          # masked lanes stay finite
    cw = jnp.maximum(sx1, tx1) - jnp.minimum(sx0, tx0)
    ch = jnp.maximum(sy1, ty1) - jnp.minimum(sy0, ty0)
    area_c = cw * ch
    giou = iou - (area_c - union) / jnp.where(match_valid, area_c, 1.0)
    loss_giou = jnp.sum((1.0 - giou) * valid_f) / num_boxes

    return {
        "loss_ce": loss_ce,
        "class_error": class_error,
        "cardinality_error": cardinality_error,
        "loss_bbox": loss_bbox,
        "loss_giou": loss_giou,
    }


# --------------------------------------------------------------------------- #
if __name__ == "__main__":
    key = jax.random.PRNGKey(0)
    k1, k2, k3, k4 = jax.random.split(key, 4)

    B, Q, C, T = 2, 64, 20, 8   # batch, queries, classes, max targets per image

    pred_logits = jax.random.normal(k1, (B, Q, C), jnp.float32)
    pred_boxes = jax.random.uniform(k2, (B, Q, 4), jnp.float32, 0.1, 0.5)   # cxcywh
    gt_boxes = jax.random.uniform(k3, (B, T, 4), jnp.float32, 0.1, 0.5)     # cxcywh
    gt_labels = jax.random.randint(k4, (B, T), 0, C).astype(jnp.int32)

    # image 0 has 5 targets, image 1 has 3; pad the rest with -1
    n_t = jnp.array([5, 3], jnp.int32)
    slot = jnp.arange(T, dtype=jnp.int32)[None, :]
    has_t = slot < n_t[:, None]
    gt_labels = jnp.where(has_t, gt_labels, -1)

    # Deterministic matcher output (stand-in for the external Hungarian matcher):
    # target k of each image is matched to query 3*k.
    src_idx = jnp.where(has_t, 3 * slot, -1).astype(jnp.int32)
    tgt_idx = jnp.where(has_t, slot, -1).astype(jnp.int32)

    fwd = jax.jit(set_criterion_forward)
    losses = fwd(pred_logits, pred_boxes, gt_labels, gt_boxes, src_idx, tgt_idx)
    losses = jax.block_until_ready(losses)

    for name, val in losses.items():
        assert val.shape == (), (name, val.shape)
        assert bool(jnp.isfinite(val)), (name, val)
    print("KERNEL_OK")
</pallas_src>

<mosaic_0001>
module attributes {stable_mosaic.version = 11 : i64} {
  func.func @_focal_card_kernel(%arg0: i32, %arg1: i32, %arg2: memref<1x64x20xf32, #tpu.memory_space<vmem>>, %arg3: memref<1x8x128xf32, #tpu.memory_space<vmem>>, %arg4: memref<1x8x128xf32, #tpu.memory_space<vmem>>) attributes {dimension_semantics = [#tpu.dimension_semantics<parallel>, #tpu.dimension_semantics<arbitrary>], iteration_bounds = array<i64: 2, 1>, scalar_prefetch = 0 : i64, scratch_operands = 0 : i64, tpu.core_type = #tpu.core_type<tc>, window_params = [{transform_indices = @transform_0, window_bounds = array<i64: 1, 64, 20>}, {transform_indices = @transform_1, window_bounds = array<i64: 1, 8, 128>}, {transform_indices = @transform_2, window_bounds = array<i64: 1, 8, 128>}]} {
    %c0_i32 = arith.constant 0 : i32
    %0 = arith.cmpi eq, %arg1, %c0_i32 : i32
    %1 = arith.extui %0 : i1 to i32
    %c0_i32_0 = arith.constant 0 : i32
    %2 = arith.cmpi ne, %1, %c0_i32_0 : i32
    scf.if %2 {
      %cst_26 = arith.constant 0.000000e+00 : f32
      %55 = vector.broadcast %cst_26 : f32 to vector<1x8x128xf32>
      %c0_27 = arith.constant 0 : index
      %c0_28 = arith.constant 0 : index
      %c0_29 = arith.constant 0 : index
      %56 = vector.load %arg3[%c0_27, %c0_28, %c0_29] : memref<1x8x128xf32, #tpu.memory_space<vmem>>, vector<1x8x128xf32>
      tpu.vector_store %arg3[%c0_27, %c0_28, %c0_29], %55 {strides = array<i32>} : memref<1x8x128xf32, #tpu.memory_space<vmem>>, vector<1x8x128xf32>,
      %cst_30 = arith.constant 0.000000e+00 : f32
      %57 = vector.broadcast %cst_30 : f32 to vector<1x8x128xf32>
      %c0_31 = arith.constant 0 : index
      %c0_32 = arith.constant 0 : index
      %c0_33 = arith.constant 0 : index
      %58 = vector.load %arg4[%c0_31, %c0_32, %c0_33] : memref<1x8x128xf32, #tpu.memory_space<vmem>>, vector<1x8x128xf32>
      tpu.vector_store %arg4[%c0_31, %c0_32, %c0_33], %57 {strides = array<i32>} : memref<1x8x128xf32, #tpu.memory_space<vmem>>, vector<1x8x128xf32>,
    } else {
    }
    %c0 = arith.constant 0 : index
    %c0_1 = arith.constant 0 : index
    %c0_2 = arith.constant 0 : index
    %3 = vector.load %arg2[%c0, %c0_1, %c0_2] : memref<1x64x20xf32, #tpu.memory_space<vmem>>, vector<1x64x20xf32>
    %4 = math.absf %3 : vector<1x64x20xf32>
    %cst = arith.constant 0.000000e+00 : f32
    %5 = vector.broadcast %cst : f32 to vector<1x64x20xf32>
    %6 = arith.subf %5, %4 : vector<1x64x20xf32>
    %7 = math.exp %6 : vector<1x64x20xf32>
    %8 = math.log1p %7 : vector<1x64x20xf32>
    %cst_3 = arith.constant 1.000000e+00 : f32
    %9 = vector.broadcast %cst_3 : f32 to vector<1x64x20xf32>
    %10 = arith.addf %9, %7 : vector<1x64x20xf32>
    %11 = tpu.reciprocal %10 {approx = true} : vector<1x64x20xf32> -> vector<1x64x20xf32>
    %cst_4 = arith.constant 0.000000e+00 : f32
    %12 = vector.broadcast %cst_4 : f32 to vector<1x64x20xf32>
    %13 = arith.cmpf oge, %3, %12 : vector<1x64x20xf32>
    %14 = arith.mulf %7, %11 : vector<1x64x20xf32>
    %15 = arith.select %13, %11, %14 : vector<1x64x20xi1>, vector<1x64x20xf32>
    %cst_5 = arith.constant 0.000000e+00 : f32
    %16 = vector.broadcast %cst_5 : f32 to vector<1x64x20xf32>
    %17 = arith.maximumf %3, %16 : vector<1x64x20xf32>
    %18 = arith.addf %17, %8 : vector<1x64x20xf32>
    %cst_6 = arith.constant 7.500000e-01 : f32
    %19 = vector.broadcast %cst_6 : f32 to vector<1x64x20xf32>
    %20 = arith.mulf %19, %18 : vector<1x64x20xf32>
    %21 = arith.mulf %20, %15 : vector<1x64x20xf32>
    %22 = arith.mulf %21, %15 : vector<1x64x20xf32>
    %c0_7 = arith.constant 0 : index
    %c0_8 = arith.constant 0 : index
    %c0_9 = arith.constant 0 : index
    %23 = vector.load %arg3[%c0_7, %c0_8, %c0_9] : memref<1x8x128xf32, #tpu.memory_space<vmem>>, vector<1x8x128xf32>
    %24 = vector.shape_cast %22 : vector<1x64x20xf32> to vector<1x1x64x20xf32>
    %cst_10 = arith.constant dense<0.000000e+00> : vector<1xf32>
    %25 = vector.multi_reduction <add>, %24, %cst_10 [1, 2, 3] : vector<1x1x64x20xf32> to vector<1xf32>
    %26 = vector.shape_cast %25 : vector<1xf32> to vector<1x1x1x1xf32>
    %27 = vector.extract %26[0, 0, 0, 0] : f32 from vector<1x1x1x1xf32>
    %28 = vector.broadcast %27 : f32 to vector<1x8x128xf32>
    %29 = arith.addf %23, %28 : vector<1x8x128xf32>
    %c0_11 = arith.constant 0 : index
    %c0_12 = arith.constant 0 : index
    %c0_13 = arith.constant 0 : index
    %30 = vector.load %arg3[%c0_11, %c0_12, %c0_13] : memref<1x8x128xf32, #tpu.memory_space<vmem>>, vector<1x8x128xf32>
    tpu.vector_store %arg3[%c0_11, %c0_12, %c0_13], %29 {strides = array<i32>} : memref<1x8x128xf32, #tpu.memory_space<vmem>>, vector<1x8x128xf32>,
    %31 = tpu.iota {dimensions = array<i32: 2>} : vector<1x64x20xi32>
    %c19_i32 = arith.constant 19 : i32
    %32 = vector.broadcast %c19_i32 : i32 to vector<1x64x20xi32>
    %33 = arith.cmpi slt, %31, %32 : vector<1x64x20xi32>
    %cst_14 = arith.constant 0xFF800000 : f32
    %34 = vector.broadcast %cst_14 : f32 to vector<1x64x20xf32>
    %35 = arith.select %33, %3, %34 : vector<1x64x20xi1>, vector<1x64x20xf32>
    %cst_15 = arith.constant dense<0xFF800000> : vector<1x64xf32>
    %36 = vector.multi_reduction <maximumf>, %35, %cst_15 [2] : vector<1x64x20xf32> to vector<1x64xf32>
    %37 = vector.shape_cast %36 : vector<1x64xf32> to vector<1x64x1xf32>
    %c19_i32_16 = arith.constant 19 : i32
    %38 = vector.broadcast %c19_i32_16 : i32 to vector<1x64x20xi32>
    %39 = arith.cmpi eq, %31, %38 : vector<1x64x20xi32>
    %cst_17 = arith.constant 0xFF800000 : f32
    %40 = vector.broadcast %cst_17 : f32 to vector<1x64x20xf32>
    %41 = arith.select %39, %3, %40 : vector<1x64x20xi1>, vector<1x64x20xf32>
    %cst_18 = arith.constant dense<0xFF800000> : vector<1x64xf32>
    %42 = vector.multi_reduction <maximumf>, %41, %cst_18 [2] : vector<1x64x20xf32> to vector<1x64xf32>
    %43 = vector.shape_cast %42 : vector<1x64xf32> to vector<1x64x1xf32>
    %44 = arith.cmpf oge, %37, %43 : vector<1x64x1xf32>
    %45 = arith.extui %44 : vector<1x64x1xi1> to vector<1x64x1xi32>
    %46 = arith.sitofp %45 : vector<1x64x1xi32> to vector<1x64x1xf32>
    %c0_19 = arith.constant 0 : index
    %c0_20 = arith.constant 0 : index
    %c0_21 = arith.constant 0 : index
    %47 = vector.load %arg4[%c0_19, %c0_20, %c0_21] : memref<1x8x128xf32, #tpu.memory_space<vmem>>, vector<1x8x128xf32>
    %48 = vector.shape_cast %46 : vector<1x64x1xf32> to vector<1x1x64x1xf32>
    %cst_22 = arith.constant dense<0.000000e+00> : vector<1xf32>
    %49 = vector.multi_reduction <add>, %48, %cst_22 [1, 2, 3] : vector<1x1x64x1xf32> to vector<1xf32>
    %50 = vector.shape_cast %49 : vector<1xf32> to vector<1x1x1x1xf32>
    %51 = vector.extract %50[0, 0, 0, 0] : f32 from vector<1x1x1x1xf32>
    %52 = vector.broadcast %51 : f32 to vector<1x8x128xf32>
    %53 = arith.addf %47, %52 : vector<1x8x128xf32>
    %c0_23 = arith.constant 0 : index
    %c0_24 = arith.constant 0 : index
    %c0_25 = arith.constant 0 : index
    %54 = vector.load %arg4[%c0_23, %c0_24, %c0_25] : memref<1x8x128xf32, #tpu.memory_space<vmem>>, vector<1x8x128xf32>
    tpu.vector_store %arg4[%c0_23, %c0_24, %c0_25], %53 {strides = array<i32>} : memref<1x8x128xf32, #tpu.memory_space<vmem>>, vector<1x8x128xf32>,
    return
  }
  func.func @transform_0(%arg0: i32, %arg1: i32) -> (i32, i32, i32) {
    %c0_i32 = arith.constant 0 : i32
    %c0_i32_0 = arith.constant 0 : i32
    return %arg0, %arg1, %c0_i32 : i32, i32, i32
  }
  func.func @transform_1(%arg0: i32, %arg1: i32) -> (i32, i32, i32) {
    %c0_i32 = arith.constant 0 : i32
    %c0_i32_0 = arith.constant 0 : i32
    %c0_i32_1 = arith.constant 0 : i32
    return %arg0, %c0_i32, %c0_i32_0 : i32, i32, i32
  }
  func.func @transform_2(%arg0: i32, %arg1: i32) -> (i32, i32, i32) {
    %c0_i32 = arith.constant 0 : i32
    %c0_i32_0 = arith.constant 0 : i32
    %c0_i32_1 = arith.constant 0 : i32
    return %arg0, %c0_i32, %c0_i32_0 : i32, i32, i32
  }
}

</mosaic_0001>

<bundles_post_ra>
// kernel: set_criterion_forward.1
= control target key start
LH: loop header
LB: loop body
LE: loop exit
PB: predicated region body
PF: predicated region fallthrough
CT: control target
= control target key end

     0   :  { %s764_s9 = smov 0   ;;  %s766_s10 = smov 0   ;;  %s1074_s0 = inlined_call_operand.vmem [shape: f32[2,64,20], index: 0, kind: input, shape index: {}]   ;;  %s1075_s1 = inlined_call_operand.vmem [shape: f32[2,8,128], index: 1, kind: output, shape index: {0}]   ;;  %s1076_s2 = inlined_call_operand.vmem [shape: f32[2,8,128], index: 2, kind: output, shape index: {1}]  }
   0x1   :  { %s768_s11 = smov 0  }
   0x2 LB: > { %s25_s12 = sadd.s32 1, %s742_s10  ;;  %p631_p0 = scmp.ge.s32.totalorder %s746_s11, 1  ;;  %s746_s11 = sphi %s768_s11, %s13_s11   ;;  %s742_s10 = sphi %s766_s10, %s1094_s10   ;;  %s738_s9 = sphi %s764_s9, %s1093_s9  }
   0x3   : > { %p27_p1 = scmp.ge.s32.totalorder %s25_s12, 2  ;;  %p134_p2 = scmp.lt.s32.totalorder %s746_s11, 3 }
   0x5   : > { %s1096_s12 = smov (%p27_p1, %s25_s12), 0  ;;  %p135_p3 = pnand %p631_p0, %p134_p2 }
   0x6   : > { %p164_p4 = scmp.lt.s32.totalorder (!%p135_p3), %s738_s9, 1 }
   0x7   : > { %138 = sbr.rel (%p135_p3) target bundleno = 392 (0x188), region = 24 }
   0xc   : > { %v408_v0 = vlaneseq  ;;  %s1098_s9 = smov (!%p164_p4, %s738_s9), 1  ;;  %vm380_vm1 = vcmask 162816  }
   0xd   : > { %s646_s13 = sshll.u32 %s1098_s9, 6  ;;  %s634_s17 = sshll.u32 %s1098_s9, 3 }
   0xe   : > { %v784_v1 = vand.u32 127, %v408_v0  ;;  %s791_s16 = scalar_lea.vmem %s1074_s0, %s646_s13  ;;  %s176_s21 = scalar_lea.vmem %s1075_s1, %s634_s17 }
   0xf   : > { %v795_v2 = vld [vmem:[%s791_s16] sm:$0xff]  ;;  %v798_v3 = vld [vmem:[%s791_s16 + $0x8] sm:$0xff]  ;;  %v814_v12 = vld [vmem:[%s791_s16 + $0x10] sm:$0xff]  ;;  %s180_s25 = scalar_lea.vmem %s1076_s2, %s634_s17 }
  0x10   : > { %vm443_vm0 = vcmp.eq.s32.totalorder %v784_v1, 19  ;;  %vm410_vm2 = vcmp.lt.s32.totalorder %v784_v1, 19  ;;  %v195_v5 = vand.u32 2147483647, %v795_v2  ;;  %v196_v8 = vand.u32 2147483647, %v798_v3 }
  0x11   : > { %v444_v4 = vsel %vm443_vm0, %v795_v2, -inf  ;;  %v411_v7 = vsel %vm410_vm2, %v795_v2, -inf  ;;  %v445_v11 = vsel %vm443_vm0, %v798_v3, -inf  ;;  %v412_v15 = vsel %vm410_vm2, %v798_v3, -inf  ;;  %v829_v23 = vld [vmem:[%s791_s16 + $0x18] sm:$0xff]  ;;  %v834_v27 = vld [vmem:[%s791_s16 + $0x20] sm:$0xff] }
  0x12   : > { %v452_v6 = vsel %vm380_vm1, %v444_v4, -inf  ;;  %v203_v9 = vsub.f32 0.0, %v195_v5  ;;  %v419_v10 = vsel %vm380_vm1, %v411_v7, -inf  ;;  %v204_v13 = vsub.f32 0.0, %v196_v8  ;;  %v845_v35 = vld [vmem:[%s791_s16 + $0x28] sm:$0xff]  ;;  %v854_v41 = vld [vmem:[%s791_s16 + $0x30] sm:$0xff] }
  0x13   : > { %453 = vmax.xlane.f32.xlu1 %v452_v6  ;;  %420 = vmax.xlane.f32.xlu0 %v419_v10  ;;  %v455_v14 = vsel %vm380_vm1, %v445_v11, -inf  ;;  %v197_v16 = vand.u32 2147483647, %v814_v12  ;;  %v422_v18 = vsel %vm380_vm1, %v412_v15, -inf  ;;  %v446_v21 = vsel %vm443_vm0, %v814_v12, -inf  ;;  %v861_v45 = vld [vmem:[%s791_s16 + $0x38] sm:$0xff] }
  0x14   : > { %v211_v17 = vmul.f32 1.442695, %v203_v9  ;;  %v213_v19 = vmul.f32 1.442695, %v204_v13  ;;  %v413_v22 = vsel %vm410_vm2, %v814_v12, -inf  ;;  %v458_v26 = vsel %vm380_vm1, %v446_v21, -inf }
  0x15   : > { %v205_v20 = vsub.f32 0.0, %v197_v16  ;;  %v198_v24 = vand.u32 2147483647, %v829_v23  ;;  %v425_v28 = vsel %vm380_vm1, %v413_v22, -inf  ;;  %v447_v30 = vsel %vm443_vm0, %v829_v23, -inf }
  0x16   : > { %676 = vpow2.f32 %v211_v17  ;;  %v199_v31 = vand.u32 2147483647, %v834_v27  ;;  %v414_v32 = vsel %vm410_vm2, %v829_v23, -inf  ;;  %v461_v36 = vsel %vm380_vm1, %v447_v30, -inf }
  0x17   : > { %456 = vmax.xlane.f32.xlu1 %v455_v14  ;;  %678 = vpow2.f32 %v213_v19  ;;  %423 = vmax.xlane.f32.xlu0 %v422_v18  ;;  %v215_v25 = vmul.f32 1.442695, %v205_v20  ;;  %v206_v29 = vsub.f32 0.0, %v198_v24  ;;  %v200_v37 = vand.u32 2147483647, %v845_v35 }
  0x18   : > { %v207_v34 = vsub.f32 0.0, %v199_v31  ;;  %v428_v38 = vsel %vm380_vm1, %v414_v32, -inf  ;;  %v448_v40 = vsel %vm443_vm0, %v834_v27, -inf  ;;  %v415_v42 = vsel %vm410_vm2, %v834_v27, -inf }
  0x19   : > { %680 = vpow2.f32 %v215_v25  ;;  %v217_v33 = vmul.f32 1.442695, %v206_v29  ;;  %v208_v43 = vsub.f32 0.0, %v200_v37  ;;  %v201_v44 = vand.u32 2147483647, %v854_v41 }
  0x1a   : > { %v219_v39 = vmul.f32 1.442695, %v207_v34  ;;  %v202_v46 = vand.u32 2147483647, %v861_v45  ;;  %v464_v47 = vsel %vm380_vm1, %v448_v40, -inf  ;;  %v431_v50 = vsel %vm380_vm1, %v415_v42, -inf }
  0x1b   : > { %459 = vmax.xlane.f32.xlu1 %v458_v26  ;;  %426 = vmax.xlane.f32.xlu0 %v425_v28  ;;  %682 = vpow2.f32 %v217_v33  ;;  %v221_v48 = vmul.f32 1.442695, %v208_v43  ;;  %v209_v49 = vsub.f32 0.0, %v201_v44  ;;  %v449_v51 = vsel %vm443_vm0, %v845_v35, -inf }
  0x1c   : > { %684 = vpow2.f32 %v219_v39  ;;  %v210_v52 = vsub.f32 0.0, %v202_v46  ;;  %v416_v53 = vsel %vm410_vm2, %v845_v35, -inf  ;;  %v339_v57 = vmax.f32 %v795_v2, 0.0 }
  0x1d   : > { %686 = vpow2.f32 %v221_v48  ;;  %v223_v54 = vmul.f32 1.442695, %v209_v49  ;;  %v467_v58 = vsel %vm380_vm1, %v449_v51, -inf  ;;  %v434_v61 = vsel %vm380_vm1, %v416_v53, -inf }
  0x1e   : > { %v225_v55 = vmul.f32 1.442695, %v210_v52  ;;  %v450_v62 = vsel %vm443_vm0, %v854_v41, -inf  ;;  %v340_v0 = vmax.f32 %v798_v3, 0.0  ;;  %v341_v4 = vmax.f32 %v814_v12, 0.0 }
  0x1f   : > { %462 = vmax.xlane.f32.xlu1 %v461_v36  ;;  %429 = vmax.xlane.f32.xlu0 %v428_v38  ;;  %688 = vpow2.f32 %v223_v54  ;;  %v417_v5 = vsel %vm410_vm2, %v854_v41, -inf  ;;  %v342_v8 = vmax.f32 %v829_v23, 0.0  ;;  %v343_v9 = vmax.f32 %v834_v27, 0.0 }
  0x20   : > { %690 = vpow2.f32 %v225_v55  ;;  %v470_v13 = vsel %vm380_vm1, %v450_v62, -inf  ;;  %v344_v14 = vmax.f32 %v845_v35, 0.0  ;;  %v437_v15 = vsel %vm380_vm1, %v417_v5, -inf }
  0x21   : > { %v451_v16 = vsel %vm443_vm0, %v861_v45, -inf  ;;  %v418_v20 = vsel %vm410_vm2, %v861_v45, -inf  ;;  %vm315_vm4 = vcmp.ge.f32.partialorder %v795_v2, 0.0  ;;  %vm316_vm6 = vcmp.ge.f32.partialorder %v798_v3, 0.0 }
  0x22   : > { %v473_v29 = vsel %vm380_vm1, %v451_v16, -inf  ;;  %v440_v1 = vsel %vm380_vm1, %v418_v20, -inf  ;;  %v345_v49 = vmax.f32 %v854_v41, 0.0  ;;  %vm317_vm8 = vcmp.ge.f32.partialorder %v814_v12, 0.0 }
  0x23   : > { %465 = vmax.xlane.f32.xlu1 %v464_v47  ;;  %v872_v56 = vpop.eup %676  ;;  %432 = vmax.xlane.f32.xlu0 %v431_v50  ;;  %vm318_vm10 = vcmp.ge.f32.partialorder %v829_v23, 0.0  ;;  %v346_v5 = vmax.f32 %v861_v45, 0.0  ;;  %vm319_vm12 = vcmp.ge.f32.partialorder %v834_v27, 0.0  ;;  %vm320_vm15 = vcmp.ge.f32.partialorder %v845_v35, 0.0 }
  0x24   : > { %v876_v59 = vpop.eup %678  ;;  %v227_v60 = vadd.f32 1.0, %v872_v56  ;;  %v230_v7 = vmul.f32 -0.5, %v872_v56  ;;  %v233_v18 = vand.u32 2147483647, %v872_v56  ;;  %vm321_vm0 = vcmp.ge.f32.partialorder %v854_v41, 0.0 }
  0x25   : > { %v236_v63 = vadd.f32 1.0, %v876_v59  ;;  %v239_v10 = vmul.f32 -0.5, %v876_v59  ;;  %v242_v22 = vand.u32 2147483647, %v876_v59  ;;  %vm322_vm2 = vcmp.ge.f32.partialorder %v861_v45, 0.0 }
  0x26   : > { %v889_v6 = vpop.eup %680  ;;  %692 = vlog2.f32 %v227_v60  ;;  %v231_v21 = vadd.f32 1.0, %v230_v7  ;;  %vm918_vm3 = vcmp.lt.f32.partialorder %v233_v18, 0.0004427343 }
  0x27   : > { %468 = vmax.xlane.f32.xlu1 %v467_v58  ;;  %694 = vrcp.f32 %v227_v60  ;;  %v245_v11 = vadd.f32 1.0, %v889_v6  ;;  %435 = vmax.xlane.f32.xlu0 %v434_v61  ;;  %v248_v19 = vmul.f32 -0.5, %v889_v6  ;;  %v240_v26 = vadd.f32 1.0, %v239_v10 }
  0x28   : > { %696 = vlog2.f32 %v236_v63  ;;  %v902_v17 = vpop.eup %682  ;;  %v251_v34 = vand.u32 2147483647, %v889_v6  ;;  %v232_v37 = vmul.f32 %v872_v56, %v231_v21  ;;  %vm927_vm5 = vcmp.lt.f32.partialorder %v242_v22, 0.0004427343 }
  0x29   : > { %698 = vrcp.f32 %v236_v63  ;;  %v254_v24 = vadd.f32 1.0, %v902_v17  ;;  %v911_v25 = vpop.eup %684  ;;  %v257_v28 = vmul.f32 -0.5, %v902_v17  ;;  %v249_v33 = vadd.f32 1.0, %v248_v19 }
  0x2a   : > { %700 = vlog2.f32 %v245_v11  ;;  %v263_v30 = vadd.f32 1.0, %v911_v25  ;;  %v266_v31 = vmul.f32 -0.5, %v911_v25  ;;  %v924_v36 = vpop.eup %686  ;;  %v260_v39 = vand.u32 2147483647, %v902_v17 }
  0x2b   : > { %471 = vmax.xlane.f32.xlu1 %v470_v13  ;;  %702 = vrcp.f32 %v245_v11  ;;  %438 = vmax.xlane.f32.xlu0 %v437_v15  ;;  %v241_v40 = vmul.f32 %v876_v59, %v240_v26  ;;  %v258_v42 = vadd.f32 1.0, %v257_v28  ;;  %v272_v43 = vadd.f32 1.0, %v924_v36 }
  0x2c   : > { %704 = vlog2.f32 %v254_v24  ;;  %v275_v44 = vmul.f32 -0.5, %v924_v36  ;;  %v936_v46 = vpop.eup %688  ;;  %v267_v47 = vadd.f32 1.0, %v266_v31  ;;  %v269_v48 = vand.u32 2147483647, %v911_v25 }
  0x2d   : > { %706 = vrcp.f32 %v254_v24  ;;  %v940_v50 = vpop.eup %690  ;;  %v250_v51 = vmul.f32 %v889_v6, %v249_v33  ;;  %vm943_vm7 = vcmp.lt.f32.partialorder %v251_v34, 0.0004427343  ;;  %v281_v53 = vadd.f32 1.0, %v936_v46 }
  0x2e   : > { %708 = vlog2.f32 %v263_v30  ;;  %vm949_vm9 = vcmp.lt.f32.partialorder %v260_v39, 0.0004427343  ;;  %v276_v55 = vadd.f32 1.0, %v275_v44  ;;  %v278_v58 = vand.u32 2147483647, %v924_v36 }
  0x2f   : > { %474 = vmax.xlane.f32.xlu1 %v473_v29  ;;  %441 = vmax.xlane.f32.xlu0 %v440_v1  ;;  %710 = vrcp.f32 %v263_v30  ;;  %v290_v60 = vadd.f32 1.0, %v940_v50  ;;  %v259_v62 = vmul.f32 %v902_v17, %v258_v42  ;;  %v284_v63 = vmul.f32 -0.5, %v936_v46 }
  0x30   : > { %712 = vlog2.f32 %v272_v43  ;;  %v268_v11 = vmul.f32 %v911_v25, %v267_v47  ;;  %vm960_vm11 = vcmp.lt.f32.partialorder %v269_v48, 0.0004427343  ;;  %v287_v18 = vand.u32 2147483647, %v936_v46 }
  0x31   : > { %714 = vlog2.f32 %v281_v53  ;;  %v293_v19 = vmul.f32 -0.5, %v940_v50  ;;  %v277_v24 = vmul.f32 %v924_v36, %v276_v55  ;;  %vm971_vm13 = vcmp.lt.f32.partialorder %v278_v58, 0.0004427343 }
  0x32   : > { %716 = vlog2.f32 %v290_v60  ;;  %v285_v1 = vadd.f32 1.0, %v284_v63  ;;  %v296_v34 = vand.u32 2147483647, %v940_v50  ;;  %vm985_vm14 = vcmp.lt.f32.partialorder %v287_v18, 0.0004427343 }
  0x33   : > { %v693_v61 = vpop.eup %692  ;;  %718 = vrcp.f32 %v272_v43  ;;  %v294_v44 = vadd.f32 1.0, %v293_v19 }
  0x34   : > { %v695_v7 = vpop.eup %694  ;;  %v229_v10 = vmul.f32 0.6931472, %v693_v61  ;;  %720 = vrcp.f32 %v281_v53 }
  0x35   : > { %v697_v15 = vpop.eup %696  ;;  %v323_v16 = vmul.f32 %v695_v7, %v872_v56  ;;  %722 = vrcp.f32 %v290_v60  ;;  %v295_v19 = vmul.f32 %v940_v50, %v294_v44 }
  0x36   : > { %v699_v20 = vpop.eup %698  ;;  %v235_v21 = vsel %vm918_vm3, %v232_v37, %v229_v10  ;;  %v238_v22 = vmul.f32 0.6931472, %v697_v15  ;;  %vm1007_vm3 = vcmp.lt.f32.partialorder %v296_v34, 0.0004427343 }
  0x37   : > { %v701_v56 = vpop.eup %700  ;;  %v347_v28 = vadd.f32 %v339_v57, %v235_v21  ;;  %v324_v29 = vmul.f32 %v699_v20, %v876_v59  ;;  %v331_v31 = vsel %vm315_vm4, %v695_v7, %v323_v16 }
  0x38   : > { %v703_v30 = vpop.eup %702  ;;  %v244_v32 = vsel %vm927_vm5, %v241_v40, %v238_v22  ;;  %v247_v33 = vmul.f32 0.6931472, %v701_v56 }
  0x39   : > { %v705_v37 = vpop.eup %704  ;;  %v355_v39 = vmul.f32 0.75, %v347_v28  ;;  %v348_v42 = vadd.f32 %v340_v0, %v244_v32  ;;  %v325_v59 = vmul.f32 %v703_v30, %v889_v6  ;;  %v332_v2 = vsel %vm316_vm6, %v699_v20, %v324_v29 }
  0x3a   : > { %v707_v43 = vpop.eup %706  ;;  %v253_v38 = vsel %vm943_vm7, %v250_v51, %v247_v33  ;;  %v256_v40 = vmul.f32 0.6931472, %v705_v37  ;;  %v286_v51 = vmul.f32 %v936_v46, %v285_v1 }
  0x3b   : > { %v709_v47 = vpop.eup %708  ;;  %v363_v48 = vmul.f32 %v355_v39, %v331_v31  ;;  %v356_v0 = vmul.f32 0.75, %v348_v42  ;;  %v349_v53 = vadd.f32 %v341_v4, %v253_v38  ;;  %v326_v6 = vmul.f32 %v707_v43, %v902_v17 }
  0x3c   : > { %v262_v3 = vsel %vm949_vm9, %v259_v62, %v256_v40  ;;  %v265_v55 = vmul.f32 0.6931472, %v709_v47  ;;  %v333_v52 = vsel %vm317_vm8, %v703_v30, %v325_v59  ;;  %v711_v58 = vpop.eup %710  ;;  %vm501_vm8 = vcmask 7168  }
  0x3d   : > { %v364_v60 = vmul.f32 %v356_v0, %v332_v2  ;;  %v357_v61 = vmul.f32 0.75, %v349_v53  ;;  %v350_v4 = vadd.f32 %v342_v8, %v262_v3  ;;  %v713_v17 = vpop.eup %712  ;;  %v327_v62 = vmul.f32 %v711_v58, %v911_v25 }
  0x3e   : > { %v271_v54 = vsel %vm960_vm11, %v268_v11, %v265_v55  ;;  %v334_v12 = vsel %vm318_vm10, %v707_v43, %v326_v6  ;;  %v371_v7 = vmul.f32 %v363_v48, %v331_v31  ;;  %v274_v10 = vmul.f32 0.6931472, %v713_v17  ;;  %v715_v18 = vpop.eup %714 }
  0x3f   : > { %v351_v15 = vadd.f32 %v343_v9, %v271_v54  ;;  %v358_v16 = vmul.f32 0.75, %v350_v4  ;;  %v365_v8 = vmul.f32 %v357_v61, %v333_v52  ;;  %v335_v20 = vsel %vm319_vm12, %v711_v58, %v327_v62  ;;  %v717_v25 = vpop.eup %716 }
  0x40   : > { %v372_v13 = vmul.f32 %v364_v60, %v332_v2  ;;  %v381_v11 = vsel %vm380_vm1, %v371_v7, 0.0  ;;  %v280_v23 = vsel %vm971_vm13, %v277_v24, %v274_v10  ;;  %v283_v21 = vmul.f32 0.6931472, %v715_v18  ;;  %v719_v28 = vpop.eup %718 }
  0x41   : > { %v359_v22 = vmul.f32 0.75, %v351_v15  ;;  %v366_v56 = vmul.f32 %v358_v16, %v334_v12  ;;  %v292_v9 = vmul.f32 0.6931472, %v717_v25  ;;  %v352_v29 = vadd.f32 %v344_v14, %v280_v23  ;;  %v721_v27 = vpop.eup %720 }
  0x42   : > { %v373_v1 = vmul.f32 %v365_v8, %v333_v52  ;;  %v382_v30 = vsel %vm380_vm1, %v372_v13, 0.0  ;;  %v289_v31 = vsel %vm985_vm14, %v286_v51, %v283_v21  ;;  %v328_v32 = vmul.f32 %v719_v28, %v924_v36  ;;  %v723_v24 = vpop.eup %722 }
  0x43   : > { %v367_v33 = vmul.f32 %v359_v22, %v335_v20  ;;  %v374_v26 = vmul.f32 %v366_v56, %v334_v12  ;;  %v298_v34 = vsel %vm1007_vm3, %v295_v19, %v292_v9  ;;  %v329_v37 = vmul.f32 %v721_v27, %v936_v46 }
  0x44   : > { %v353_v14 = vadd.f32 %v345_v49, %v289_v31  ;;  %v360_v39 = vmul.f32 0.75, %v352_v29  ;;  %v330_v42 = vmul.f32 %v723_v24, %v940_v50  ;;  %v336_v57 = vsel %vm320_vm15, %v719_v28, %v328_v32 }
  0x45   : > { %v354_v36 = vadd.f32 %v346_v5, %v298_v34  ;;  %v375_v59 = vmul.f32 %v367_v33, %v335_v20  ;;  %v337_v43 = vsel %vm321_vm0, %v721_v27, %v329_v37  ;;  %v383_v40 = vadd.f32 %v382_v30, %v381_v11 }
  0x46   : > { %v361_v2 = vmul.f32 0.75, %v353_v14  ;;  %v368_v38 = vmul.f32 %v360_v39, %v336_v57  ;;  %v338_v46 = vsel %vm322_vm2, %v723_v24, %v330_v42  ;;  %v384_v44 = vsel %vm380_vm1, %v373_v1, 0.0 }
  0x47   : > { %v362_v49 = vmul.f32 0.75, %v354_v36  ;;  %v386_v50 = vsel %vm380_vm1, %v374_v26, 0.0  ;;  %v385_v48 = vadd.f32 %v384_v44, %v383_v40  ;;  %v388_v5 = vsel %vm380_vm1, %v375_v59, 0.0 }
  0x48   : > { %v369_v35 = vmul.f32 %v361_v2, %v337_v43  ;;  %v376_v47 = vmul.f32 %v368_v38, %v336_v57  ;;  %v748_v10 = vmov 0.0  }
  0x49   : > { %v370_v0 = vmul.f32 %v362_v49, %v338_v46  ;;  %v387_v41 = vadd.f32 %v386_v50, %v385_v48 }
  0x4a   : > { %v377_v53 = vmul.f32 %v369_v35, %v337_v43  ;;  %v390_v3 = vsel %vm380_vm1, %v376_v47, 0.0 }
  0x4b   : > { %v378_v6 = vmul.f32 %v370_v0, %v338_v46  ;;  %v389_v55 = vadd.f32 %v388_v5, %v387_v41 }
  0x4c   : > { %v392_v45 = vsel %vm380_vm1, %v377_v53, 0.0 }
  0x4d   : > { %v391_v51 = vadd.f32 %v390_v3, %v389_v55  ;;  %v394_v52 = vsel %vm380_vm1, %v378_v6, 0.0 }
  0x4f   : > { %v393_v58 = vadd.f32 %v392_v45, %v391_v51 }
  0x51   : > { %v395_v60 = vadd.f32 %v394_v52, %v393_v58 }
  0x53   : > { %396 = vadd.xlane.f32.xlu0 %v395_v60 }
  0x9c   : > { %v454_v61 = vpop.xlane.xlu1 %453  ;;  %v421_v4 = vpop.xlane.xlu0 %420 }
  0x9d   : > { %vm476_vm5 = vcmp.ge.f32.partialorder %v421_v4, %v454_v61 }
  0x9e   : > { %v636_v8 = vsel %vm476_vm5, 1.0, %v748_v10 }
  0x9f   : > { %v502_v11 = vsel %vm501_vm8, %v636_v8, 0.0 }
  0xa0   : > { %v457_v63 = vpop.xlane.xlu1 %456  ;;  %v424_v17 = vpop.xlane.xlu0 %423 }
  0xa1   : > { %vm477_vm4 = vcmp.ge.f32.partialorder %v424_v17, %v457_v63 }
  0xa2   : > { %v637_v15 = vsel %vm477_vm4, 1.0, %v748_v10 }
  0xa3   : > { %v503_v20 = vsel %vm501_vm8, %v637_v15, 0.0 }
  0xa4   : > { %v460_v54 = vpop.xlane.xlu1 %459  ;;  %v427_v62 = vpop.xlane.xlu0 %426  ;;  %v504_v21 = vadd.f32 %v503_v20, %v502_v11 }
  0xa5   : > { %vm478_vm6 = vcmp.ge.f32.partialorder %v427_v62, %v460_v54 }
  0xa6   : > { %v638_v18 = vsel %vm478_vm6, 1.0, %v748_v10 }
  0xa7   : > { %v505_v25 = vsel %vm501_vm8, %v638_v18, 0.0 }
  0xa8   : > { %v463_v12 = vpop.xlane.xlu1 %462  ;;  %v430_v7 = vpop.xlane.xlu0 %429  ;;  %v506_v9 = vadd.f32 %v505_v25, %v504_v21 }
  0xa9   : > { %vm479_vm7 = vcmp.ge.f32.partialorder %v430_v7, %v463_v12 }
  0xaa   : > { %v639_v13 = vsel %vm479_vm7, 1.0, %v748_v10 }
  0xab   : > { %v507_v28 = vsel %vm501_vm8, %v639_v13, 0.0 }
  0xac   : > { %v466_v16 = vpop.xlane.xlu1 %465  ;;  %v433_v19 = vpop.xlane.xlu0 %432  ;;  %v508_v27 = vadd.f32 %v507_v28, %v506_v9 }
  0xad   : > { %vm480_vm1 = vcmp.ge.f32.partialorder %v433_v19, %v466_v16 }
  0xae   : > { %v640_v22 = vsel %vm480_vm1, 1.0, %v748_v10 }
  0xaf   : > { %v509_v1 = vsel %vm501_vm8, %v640_v22, 0.0 }
  0xb0   : > { %v469_v23 = vpop.xlane.xlu1 %468  ;;  %v436_v56 = vpop.xlane.xlu0 %435  ;;  %v510_v33 = vadd.f32 %v509_v1, %v508_v27 }
  0xb1   : > { %vm481_vm9 = vcmp.ge.f32.partialorder %v436_v56, %v469_v23 }
  0xb2   : > { %v641_v29 = vsel %vm481_vm9, 1.0, %v748_v10 }
  0xb3   : > { %v511_v32 = vsel %vm501_vm8, %v641_v29, 0.0 }
  0xb4   : > { %v472_v30 = vpop.xlane.xlu1 %471  ;;  %v439_v31 = vpop.xlane.xlu0 %438  ;;  %v512_v37 = vadd.f32 %v511_v32, %v510_v33 }
  0xb5   : > { %vm482_vm10 = vcmp.ge.f32.partialorder %v439_v31, %v472_v30 }
  0xb6   : > { %v642_v26 = vsel %vm482_vm10, 1.0, %v748_v10 }
  0xb7   : > { %v513_v24 = vsel %vm501_vm8, %v642_v26, 0.0 }
  0xb8   : > { %v475_v34 = vpop.xlane.xlu1 %474  ;;  %v442_v14 = vpop.xlane.xlu0 %441  ;;  %v514_v42 = vadd.f32 %v513_v24, %v512_v37 }
  0xb9   : > { %vm483_vm11 = vcmp.ge.f32.partialorder %v442_v14, %v475_v34 }
  0xba   : > { %v643_v39 = vsel %vm483_vm11, 1.0, %v748_v10 }
  0xbb   : > { %v515_v57 = vsel %vm501_vm8, %v643_v39, 0.0 }
  0xbc   : > { %v516_v36 = vadd.f32 %v515_v57, %v514_v42 }
  0xbe   : > { %517 = vadd.xlane.f32.xlu1 %v516_v36 }
  0xdc   : > { %v397_v59 = vpop.xlane.xlu0 %396 }
  0xdd   : > { %v398_v43 = vrot.slane %v397_v59, 4 }
  0xdf   : > { %v399_v2 = vadd.f32 %v398_v43, %v397_v59 }
  0xe1   : > { %v400_v38 = vrot.slane %v399_v2, 2 }
  0xe3   : > { %v401_v40 = vadd.f32 %v400_v38, %v399_v2 }
  0xe5   : > { %v402_v46 = vrot.slane %v401_v40, 1 }
  0xe7   : > { %v403_v49 = vadd.f32 %v402_v46, %v401_v40 }
  0xe9   : > { %647 = vpush %v403_v49 }
 0x11a   : > { %s648_s18 = spop %647 }
 0x11b   : > { %v405_v44 = vstv %s648_s18 }
 0x11c   : > { %407 = vst [vmem:[%s176_s21] sm:$0xff] %v405_v44 }
 0x147   : > { %v518_v50 = vpop.xlane.xlu1 %517 }
 0x148   : > { %v519_v35 = vrot.slane %v518_v50, 4 }
 0x14a   : > { %v520_v47 = vadd.f32 %v519_v35, %v518_v50 }
 0x14c   : > { %v521_v48 = vrot.slane %v520_v47, 2 }
 0x14e   : > { %v522_v0 = vadd.f32 %v521_v48, %v520_v47 }
 0x150   : > { %v523_v5 = vrot.slane %v522_v0, 1 }
 0x152   : > { %v524_v53 = vadd.f32 %v523_v5, %v522_v0 }
 0x154   : > { %649 = vpush %v524_v53 }
 0x185   : > { %s650_s22 = spop %649 }
 0x186   : > { %v526_v41 = vstv %s650_s22 }
 0x187   : > { %528 = vst [vmem:[%s180_s25] sm:$0xff] %v526_v41 }
 0x188 PF: > { %s13_s11 = sadd.s32 1, %s746_s11   ;;  %s1093_s9 = smov %s742_s10 }
 0x189   : > { %p10_p5 = scmp.ge.s32.totalorder %s13_s11, 4   ;;  %s1094_s10 = smov %s1096_s12 }
 0x18b   :  { %12 = sbr.rel (!%p10_p5) target bundleno = 2 (0x2), region = 70 }

</bundles_post_ra>
